<compile_context>
chip_gen: v7x
topology: tpu7x:2x2x1
jax: 0.10.0
libtpu: 0.0.40
codegen_flags: <defaults>
</compile_context>

<pallas_src>
import jax
import jax.numpy as jnp
from jax.experimental import pallas as pl
from jax.experimental.pallas import tpu as pltpu


def _discriminator_kernel(x_ref, w1_ref, b1_ref, w2_ref, b2_ref,
                          rep_ref, logit_ref, prob_ref):
    # Hidden layer: Linear + LeakyReLU(0.2).  All math in f32 (v5e has no bf16 VPU/EUP).
    x = x_ref[...].astype(jnp.float32)
    h = jnp.dot(x, w1_ref[...].astype(jnp.float32),
                preferred_element_type=jnp.float32) + b1_ref[...].astype(jnp.float32)
    h = jnp.where(h > 0, h, 0.2 * h)            # LeakyReLU(negative_slope=0.2)
    rep_ref[...] = h.astype(rep_ref.dtype)      # unpadded (block_b, hidden) store

    # Output head: Linear -> logits (true nout width, no padded lanes).
    logits = jnp.dot(h, w2_ref[...].astype(jnp.float32),
                     preferred_element_type=jnp.float32) + b2_ref[...].astype(jnp.float32)
    logit_ref[...] = logits.astype(logit_ref.dtype)

    # Numerically stable softmax over the nout valid columns.
    m = jnp.max(logits, axis=-1, keepdims=True)
    e = jnp.exp(logits - m)
    denom = jnp.sum(e, axis=-1, keepdims=True)
    r = pl.reciprocal(denom, approx=True)       # EUP vrcp (otherwise-idle slot)
    r = r * (2.0 - denom * r)                   # one Newton step -> ~f32 precision
    prob_ref[...] = (e * r).astype(prob_ref.dtype)


def _round_up(x, m):
    return (x + m - 1) // m * m


def _pad_rows(a, rows):
    if a.shape[0] == rows:
        return a
    return jnp.pad(a, ((0, rows - a.shape[0]), (0, 0)))


def discriminator_forward(x, w1, b1, w2, b2, *, block_b=None):
    """x: [B, input_size]; w: [in, out]; b: [1, out] (or [out]).
    Returns (last_rep, logits, probs) matching the PyTorch module's forward (eval mode)."""
    B, din = x.shape
    hidden = w1.shape[1]
    nout = w2.shape[1]
    dtype = x.dtype

    if block_b is None:
        # >=2 grid steps whenever B > 8 (v7x second TensorCore), capped at 2048 rows so
        # per-step DMA overhead is amortized at large B without stressing VMEM.
        block_b = min(2048, _round_up(max(-(-B // 2), 8), 8))
    block_b = max(8, _round_up(block_b, 8))
    Bp = _round_up(B, block_b)

    # Only the batch dim is padded; feature dims stay at their true widths.
    xp = _pad_rows(x, Bp)
    b1r = b1.reshape(1, hidden)
    b2r = b2.reshape(1, nout)

    grid = (Bp // block_b,)
    nsteps = grid[0]

    itemsize = jnp.dtype(dtype).itemsize
    bytes_accessed = (
        Bp * din * itemsize                                                    # x read
        + nsteps * (din * hidden + hidden + hidden * nout + nout) * itemsize   # weights/biases
        + Bp * (hidden + 2 * nout) * itemsize                                  # rep/logits/probs writes
    )
    cost = pl.CostEstimate(
        flops=int(2 * Bp * din * hidden + 2 * Bp * hidden * nout),
        transcendentals=int(Bp * nout),
        bytes_accessed=int(bytes_accessed),
    )

    rep, logits, probs = pl.pallas_call(
        _discriminator_kernel,
        out_shape=(
            jax.ShapeDtypeStruct((Bp, hidden), dtype),
            jax.ShapeDtypeStruct((Bp, nout), dtype),
            jax.ShapeDtypeStruct((Bp, nout), dtype),
        ),
        grid_spec=pltpu.PrefetchScalarGridSpec(
            num_scalar_prefetch=0,
            grid=grid,
            in_specs=[
                pl.BlockSpec((block_b, din), lambda i: (i, 0)),   # x tile
                pl.BlockSpec((din, hidden), lambda i: (0, 0)),    # W1 (constant index -> no re-DMA)
                pl.BlockSpec((1, hidden), lambda i: (0, 0)),      # b1
                pl.BlockSpec((hidden, nout), lambda i: (0, 0)),   # W2
                pl.BlockSpec((1, nout), lambda i: (0, 0)),        # b2
            ],
            out_specs=[
                pl.BlockSpec((block_b, hidden), lambda i: (i, 0)),  # last_rep
                pl.BlockSpec((block_b, nout), lambda i: (i, 0)),    # logits
                pl.BlockSpec((block_b, nout), lambda i: (i, 0)),    # probs
            ],
        ),
        compiler_params=pltpu.CompilerParams(
            dimension_semantics=("parallel",)),
        cost_estimate=cost,
    )(xp, w1, b1r, w2, b2r)

    # Strip batch padding.
    return rep[:B], logits[:B], probs[:B]


def _reference_forward(x, w1, b1, w2, b2):
    h = x @ w1 + b1.reshape(1, -1)
    h = jnp.where(h > 0, h, 0.2 * h)
    logits = h @ w2 + b2.reshape(1, -1)
    probs = jax.nn.softmax(logits, axis=-1)
    return h, logits, probs


if __name__ == "__main__":
    # Small shapes consistent with the module: input_size=64, hidden_sizes=[32],
    # num_labels=3  ->  logit dim = num_labels + 1 = 4.
    B, INPUT_SIZE, HIDDEN, NUM_LABELS = 16, 64, 32, 3
    NOUT = NUM_LABELS + 1

    key = jax.random.PRNGKey(0)
    kx, kw1, kb1, kw2, kb2 = jax.random.split(key, 5)

    x = jax.random.normal(kx, (B, INPUT_SIZE), dtype=jnp.float32)
    # Deterministic synthetic parameter init (Linear: weight [in, out], bias [1, out]).
    w1 = jax.random.normal(kw1, (INPUT_SIZE, HIDDEN), dtype=jnp.float32) * (1.0 / INPUT_SIZE ** 0.5)
    b1 = jax.random.normal(kb1, (1, HIDDEN), dtype=jnp.float32) * 0.01
    w2 = jax.random.normal(kw2, (HIDDEN, NOUT), dtype=jnp.float32) * (1.0 / HIDDEN ** 0.5)
    b2 = jax.random.normal(kb2, (1, NOUT), dtype=jnp.float32) * 0.01

    # Default block_b picks 8-row tiles here -> grid=(2,), exercising a multi-step
    # parallel grid at this tiny test size (realistic batches get up to 2048-row tiles).
    last_rep, logits, probs = discriminator_forward(x, w1, b1, w2, b2)
    jax.block_until_ready((last_rep, logits, probs))

    ref_rep, ref_logits, ref_probs = _reference_forward(x, w1, b1, w2, b2)
    assert last_rep.shape == (B, HIDDEN) and logits.shape == (B, NOUT) and probs.shape == (B, NOUT)
    assert jnp.allclose(last_rep, ref_rep, atol=1e-5, rtol=1e-5)
    assert jnp.allclose(logits, ref_logits, atol=1e-5, rtol=1e-5)
    assert jnp.allclose(probs, ref_probs, atol=1e-4, rtol=1e-4)

    print("KERNEL_OK")
</pallas_src>

<mosaic_0001>
module attributes {stable_mosaic.version = 11 : i64} {
  func.func @_discriminator_kernel(%arg0: i32, %arg1: memref<8x64xf32, #tpu.memory_space<vmem>>, %arg2: memref<64x32xf32, #tpu.memory_space<vmem>>, %arg3: memref<1x32xf32, #tpu.memory_space<vmem>>, %arg4: memref<32x4xf32, #tpu.memory_space<vmem>>, %arg5: memref<1x4xf32, #tpu.memory_space<vmem>>, %arg6: memref<8x32xf32, #tpu.memory_space<vmem>>, %arg7: memref<8x4xf32, #tpu.memory_space<vmem>>, %arg8: memref<8x4xf32, #tpu.memory_space<vmem>>) attributes {dimension_semantics = [#tpu.dimension_semantics<parallel>], iteration_bounds = array<i64: 2>, scalar_prefetch = 0 : i64, scratch_operands = 0 : i64, tpu.core_type = #tpu.core_type<tc>, window_params = [{transform_indices = @transform_0, window_bounds = array<i64: 8, 64>}, {pipeline_mode = #tpu.pipeline_mode<synchronous>, transform_indices = @transform_1, window_bounds = array<i64: 64, 32>}, {pipeline_mode = #tpu.pipeline_mode<synchronous>, transform_indices = @transform_2, window_bounds = array<i64: 1, 32>}, {pipeline_mode = #tpu.pipeline_mode<synchronous>, transform_indices = @transform_3, window_bounds = array<i64: 32, 4>}, {pipeline_mode = #tpu.pipeline_mode<synchronous>, transform_indices = @transform_4, window_bounds = array<i64: 1, 4>}, {transform_indices = @transform_5, window_bounds = array<i64: 8, 32>}, {transform_indices = @transform_6, window_bounds = array<i64: 8, 4>}, {transform_indices = @transform_7, window_bounds = array<i64: 8, 4>}]} {
    %c0 = arith.constant 0 : index
    %c0_0 = arith.constant 0 : index
    %0 = vector.load %arg1[%c0, %c0_0] : memref<8x64xf32, #tpu.memory_space<vmem>>, vector<8x64xf32>
    %c0_1 = arith.constant 0 : index
    %c0_2 = arith.constant 0 : index
    %1 = vector.load %arg2[%c0_1, %c0_2] : memref<64x32xf32, #tpu.memory_space<vmem>>, vector<64x32xf32>
    %cst = arith.constant dense<0.000000e+00> : vector<8x32xf32>
    %2 = tpu.matmul %0, %1, %cst {dimension_numbers = #tpu.dot_dimension_numbers<[1], [0], [0], [1], [0, 0, 1, 1], [], []>} : vector<8x64xf32>, vector<64x32xf32>, vector<8x32xf32> -> vector<8x32xf32>
    %c0_3 = arith.constant 0 : index
    %c0_4 = arith.constant 0 : index
    %3 = vector.load %arg3[%c0_3, %c0_4] : memref<1x32xf32, #tpu.memory_space<vmem>>, vector<1x32xf32>
    %4 = vector.broadcast %3 : vector<1x32xf32> to vector<8x32xf32>
    %5 = arith.addf %2, %4 : vector<8x32xf32>
    %cst_5 = arith.constant 0.000000e+00 : f32
    %6 = vector.broadcast %cst_5 : f32 to vector<8x32xf32>
    %7 = arith.cmpf ogt, %5, %6 : vector<8x32xf32>
    %cst_6 = arith.constant 2.000000e-01 : f32
    %8 = vector.broadcast %cst_6 : f32 to vector<8x32xf32>
    %9 = arith.mulf %8, %5 : vector<8x32xf32>
    %10 = arith.select %7, %5, %9 : vector<8x32xi1>, vector<8x32xf32>
    %c0_7 = arith.constant 0 : index
    %c0_8 = arith.constant 0 : index
    %11 = vector.load %arg6[%c0_7, %c0_8] : memref<8x32xf32, #tpu.memory_space<vmem>>, vector<8x32xf32>
    tpu.vector_store %arg6[%c0_7, %c0_8], %10 {strides = array<i32>} : memref<8x32xf32, #tpu.memory_space<vmem>>, vector<8x32xf32>,
    %c0_9 = arith.constant 0 : index
    %c0_10 = arith.constant 0 : index
    %12 = vector.load %arg4[%c0_9, %c0_10] : memref<32x4xf32, #tpu.memory_space<vmem>>, vector<32x4xf32>
    %cst_11 = arith.constant dense<0.000000e+00> : vector<8x4xf32>
    %13 = tpu.matmul %10, %12, %cst_11 {dimension_numbers = #tpu.dot_dimension_numbers<[1], [0], [0], [1], [0, 0, 1, 1], [], []>} : vector<8x32xf32>, vector<32x4xf32>, vector<8x4xf32> -> vector<8x4xf32>
    %c0_12 = arith.constant 0 : index
    %c0_13 = arith.constant 0 : index
    %14 = vector.load %arg5[%c0_12, %c0_13] : memref<1x4xf32, #tpu.memory_space<vmem>>, vector<1x4xf32>
    %15 = vector.broadcast %14 : vector<1x4xf32> to vector<8x4xf32>
    %16 = arith.addf %13, %15 : vector<8x4xf32>
    %c0_14 = arith.constant 0 : index
    %c0_15 = arith.constant 0 : index
    %17 = vector.load %arg7[%c0_14, %c0_15] : memref<8x4xf32, #tpu.memory_space<vmem>>, vector<8x4xf32>
    tpu.vector_store %arg7[%c0_14, %c0_15], %16 {strides = array<i32>} : memref<8x4xf32, #tpu.memory_space<vmem>>, vector<8x4xf32>,
    %cst_16 = arith.constant dense<0xFF800000> : vector<8xf32>
    %18 = vector.multi_reduction <maximumf>, %16, %cst_16 [1] : vector<8x4xf32> to vector<8xf32>
    %19 = vector.shape_cast %18 : vector<8xf32> to vector<8x1xf32>
    %20 = vector.broadcast %19 : vector<8x1xf32> to vector<8x4xf32>
    %21 = arith.subf %16, %20 : vector<8x4xf32>
    %22 = math.exp %21 : vector<8x4xf32>
    %cst_17 = arith.constant dense<0.000000e+00> : vector<8xf32>
    %23 = vector.multi_reduction <add>, %22, %cst_17 [1] : vector<8x4xf32> to vector<8xf32>
    %24 = vector.shape_cast %23 : vector<8xf32> to vector<8x1xf32>
    %25 = tpu.reciprocal %24 {approx = true} : vector<8x1xf32> -> vector<8x1xf32>
    %26 = arith.mulf %24, %25 : vector<8x1xf32>
    %cst_18 = arith.constant 2.000000e+00 : f32
    %27 = vector.broadcast %cst_18 : f32 to vector<8x1xf32>
    %28 = arith.subf %27, %26 : vector<8x1xf32>
    %29 = arith.mulf %25, %28 : vector<8x1xf32>
    %30 = vector.broadcast %29 : vector<8x1xf32> to vector<8x4xf32>
    %31 = arith.mulf %22, %30 : vector<8x4xf32>
    %c0_19 = arith.constant 0 : index
    %c0_20 = arith.constant 0 : index
    %32 = vector.load %arg8[%c0_19, %c0_20] : memref<8x4xf32, #tpu.memory_space<vmem>>, vector<8x4xf32>
    tpu.vector_store %arg8[%c0_19, %c0_20], %31 {strides = array<i32>} : memref<8x4xf32, #tpu.memory_space<vmem>>, vector<8x4xf32>,
    return
  }
  func.func @transform_0(%arg0: i32) -> (i32, i32) {
    %c0_i32 = arith.constant 0 : i32
    %c0_i32_0 = arith.constant 0 : i32
    return %arg0, %c0_i32 : i32, i32
  }
  func.func @transform_1(%arg0: i32) -> (i32, i32) {
    %c0_i32 = arith.constant 0 : i32
    %c0_i32_0 = arith.constant 0 : i32
    %c0_i32_1 = arith.constant 0 : i32
    return %c0_i32, %c0_i32_0 : i32, i32
  }
  func.func @transform_2(%arg0: i32) -> (i32, i32) {
    %c0_i32 = arith.constant 0 : i32
    %c0_i32_0 = arith.constant 0 : i32
    %c0_i32_1 = arith.constant 0 : i32
    return %c0_i32, %c0_i32_0 : i32, i32
  }
  func.func @transform_3(%arg0: i32) -> (i32, i32) {
    %c0_i32 = arith.constant 0 : i32
    %c0_i32_0 = arith.constant 0 : i32
    %c0_i32_1 = arith.constant 0 : i32
    return %c0_i32, %c0_i32_0 : i32, i32
  }
  func.func @transform_4(%arg0: i32) -> (i32, i32) {
    %c0_i32 = arith.constant 0 : i32
    %c0_i32_0 = arith.constant 0 : i32
    %c0_i32_1 = arith.constant 0 : i32
    return %c0_i32, %c0_i32_0 : i32, i32
  }
  func.func @transform_5(%arg0: i32) -> (i32, i32) {
    %c0_i32 = arith.constant 0 : i32
    %c0_i32_0 = arith.constant 0 : i32
    return %arg0, %c0_i32 : i32, i32
  }
  func.func @transform_6(%arg0: i32) -> (i32, i32) {
    %c0_i32 = arith.constant 0 : i32
    %c0_i32_0 = arith.constant 0 : i32
    return %arg0, %c0_i32 : i32, i32
  }
  func.func @transform_7(%arg0: i32) -> (i32, i32) {
    %c0_i32 = arith.constant 0 : i32
    %c0_i32_0 = arith.constant 0 : i32
    return %arg0, %c0_i32 : i32, i32
  }
}

</mosaic_0001>

<bundles_post_ra>
// kernel: tpu_custom_call.1
= control target key start
LH: loop header
LB: loop body
LE: loop exit
PB: predicated region body
PF: predicated region fallthrough
CT: control target
= control target key end

     0   :  { %13 = vsyncpa [#allocation3], 0  ;;  %s1013_s0 = inlined_call_operand.vmem [shape: f32[16,64], index: 0, kind: input, shape index: {}]   ;;  %s1014_s1 = inlined_call_operand.vmem [shape: f32[64,32], index: 1, kind: input, shape index: {}]   ;;  %s1015_s2 = inlined_call_operand.vmem [shape: f32[1,32], index: 2, kind: input, shape index: {}]   ;;  %s1016_s3 = inlined_call_operand.vmem [shape: f32[32,4], index: 3, kind: input, shape index: {}]   ;;  %s1017_s4 = inlined_call_operand.vmem [shape: f32[1,4], index: 4, kind: input, shape index: {}]   ;;  %s1018_s5 = inlined_call_operand.hbm [shape: f32[16,32], index: 5, kind: output, shape index: {0}]   ;;  %s1019_s6 = inlined_call_operand.vmem [shape: f32[16,4], index: 6, kind: output, shape index: {1}]   ;;  %s1020_s7 = inlined_call_operand.vmem [shape: f32[16,4], index: 7, kind: output, shape index: {2}]  }
   0x1   :  { %15 = vsyncpa [#allocation3 + $0x1], 0  ;;  %s858_s24 = smov 0   ;;  %s860_s25 = smov 0  }
   0x2   :  { %s862_s26 = smov 0   ;;  %s864_s27 = smov 0  }
   0x3 LB: > { %s879_s28 = sadd.s32 4294967295, %s812_s27   ;;  %s626_s29 = sadd.s32 4294967294, %s812_s27   ;;  %s812_s27 = sphi %s864_s27, %s1026_s27   ;;  %s808_s26 = sphi %s862_s26, %s1025_s26   ;;  %s804_s25 = sphi %s860_s25, %s1024_s25   ;;  %s800_s24 = sphi %s858_s24, %s1023_s24  }
   0x4   : > { %s883_s30 = sadd.s32 1, %s812_s27   ;;  %s138_s8 = sadd.s32 1, %s808_s26 }
   0x5   : > { %s135_s9 = ssub.s32 %s812_s27, %s883_s30  ;;  %p148_p0 = scmp.ne.s32.totalorder %s808_s26, %s804_s25 }
   0x6   : > { %p136_p1 = scmp.eq.s32.totalorder %s135_s9, 0  ;;  %p149_p2 = scmp.eq.s32.totalorder %s879_s28, 1 }
   0x7   : > { %p154_p3 = scmp.ne.s32.totalorder %s804_s25, %s800_s24  ;;  %p155_p4 = scmp.eq.s32.totalorder %s626_s29, 1 }
   0x8   : > { %s894_s10 = scalar_select %p136_p1, %s808_s26, %s138_s8  }
   0x9   : > { %p896_p5 = por %p149_p2, %p148_p0  ;;  %p900_p6 = por %p155_p4, %p154_p3 }
   0xa   : > { %p629_p7 = scmp.ge.s32.totalorder %s812_s27, 1  ;;  %p244_p8 = scmp.lt.s32.totalorder %s812_s27, 3 }
   0xc   : > { %p245_p9 = pnand %p629_p7, %p244_p8 }
   0xd   : > { %v296_v0 = vld [vmem:[%s1014_s1] sm:$0xff] (!%p245_p9)  ;;  %v297_v1 = vld [vmem:[%s1014_s1 + $0x8] sm:$0xff] (!%p245_p9)  ;;  %v298_v2 = vld [vmem:[%s1014_s1 + $0x10] sm:$0xff] (!%p245_p9)  ;;  %v814_v3 = vmov (!%p245_p9), 0.0|0.0   ;;  %vm815_vm0 = vmmov (!%p245_p9), 0   ;;  %v816_v6 = vmov (!%p245_p9), 0.0  }
   0xe   : > { %248 = sbr.rel (%p245_p9) target bundleno = 783 (0x30f), region = 40  ;;  %686 = vmatprep.subr.bf16.mxu0 (!%p245_p9), %v814_v3  ;;  %v687_v4 = vpack.c.bf16 (!%p245_p9), %v297_v1, %v296_v0  ;;  %v299_v5 = vld [vmem:[%s1014_s1 + $0x18] sm:$0xff] (!%p245_p9)  ;;  %672 = vmatprep.mubr.msk.f32.mxu0 (!%p245_p9), %vm815_vm0, %v816_v6  ;;  %p283_p10 = scmp.lt.s32.totalorder (!%p245_p9), %s879_s28, 1  ;;  %v390_v7 = vld [vmem:[%s1016_s3] sm:$0xff] (!%p245_p9)  ;;  %v391_v9 = vld [vmem:[%s1016_s3 + $0x8] sm:$0xff] (!%p245_p9)  ;;  %vm311_vm1 = vcmask (!%p245_p9), 523264  }
   0xf   : > { %698 = vmatprep.subr.bf16.mxu1 (!%p245_p9), %v814_v3  ;;  %683 = vmatprep.mubr.msk.f32.mxu1 (!%p245_p9), %vm815_vm0, %v816_v6  ;;  %v690_v8 = vpack.c.bf16 (!%p245_p9), %v299_v5, %v298_v2  ;;  %v300_v10 = vld [vmem:[%s1014_s1 + $0x20] sm:$0xff] (!%p245_p9)  ;;  %v301_v11 = vld [vmem:[%s1014_s1 + $0x28] sm:$0xff] (!%p245_p9)  ;;  %v699_v12 = vpack.c.bf16 (!%p245_p9), %v391_v9, %v390_v7  ;;  %v302_v14 = vld [vmem:[%s1014_s1 + $0x30] sm:$0xff] (!%p245_p9)  ;;  %s268_s14 = sand.u32 (!%p245_p9), 1, %s804_s25   ;;  %vm388_vm3 = vcmask (!%p245_p9), 261120   ;;  %vm474_vm4 = vcmask (!%p245_p9), 31744  }
  0x10   : > { %688 = vmatpush3.bf16.msra.mxu0 (!%p245_p9), %v687_v4  ;;  %v693_v13 = vpack.c.bf16 (!%p245_p9), %v301_v11, %v300_v10  ;;  %v303_v15 = vld [vmem:[%s1014_s1 + $0x38] sm:$0xff] (!%p245_p9)  ;;  %v392_v18 = vld [vmem:[%s1016_s3 + $0x10] sm:$0xff] (!%p245_p9)  ;;  %v634_v21 = vld [vmem:[%s1015_s2] ss:$0 sm:$0xff] (!%p245_p9)  ;;  %s630_s17 = sshll.u32 (!%p245_p9), %s268_s14, 3  ;;  %s639_s8 = sshll.u32 (!%p245_p9), %s879_s28, 7 }
  0x11   : > { %689 = vmatprep.subr.bf16.mxu0 (!%p245_p9), %v814_v3  ;;  %700 = vmatpush3.bf16.msra.mxu1 (!%p245_p9), %v699_v12  ;;  %v696_v16 = vpack.c.bf16 (!%p245_p9), %v303_v15, %v302_v14  ;;  %v393_v19 = vld [vmem:[%s1016_s3 + $0x18] sm:$0xff] (!%p245_p9)  ;;  %s270_s18 = scalar_lea.vmem (!%p245_p9), [#allocation2], %s630_s17  ;;  %v636_v27 = vld [vmem:[%s1017_s4] ss:$0 sm:$0xff] (!%p245_p9)  ;;  %s970_s16 = scalar_lea.hbm (!%p245_p9), %s1018_s5, %s639_s8 }
  0x12   : > { %701 = vmatprep.subr.bf16.mxu1 (!%p245_p9), %v814_v3  ;;  %v702_v20 = vpack.c.bf16 (!%p245_p9), %v393_v19, %v392_v18  ;;  %s513_s9 = sshll.u32 (!%p245_p9), %s270_s18, 4  ;;  %s492_s17 = scalar_lea.sflag (!%p245_p9), [#allocation3], %s268_s14  ;;  %s514_s9 = int_to_ptr.vmem [resolvable:$true] %s513_s9 }
  0x13   : > { %s750_s19 = scalar_lea.vmem (!%p245_p9), %s514_s9, 128  ;;  %s817_s21 = smov (!%p245_p9), [#allocation2]  }
  0x14   : > { %691 = vmatpush3.bf16.msra.mxu0 (!%p245_p9), %v690_v8  ;;  %p751_p11 = scmp.ne.s32.totalorder (!%p245_p9), %s514_s9, %s750_s19  ;;  %s754_s22 = sshll.u32 (!%p245_p9), %s817_s21, 4  ;;  %s755_s22 = int_to_ptr.vmem [resolvable:$false] %s754_s22 }
  0x15   : > { %s284_s15 = scalar_select %p283_p10, %s879_s28, 1  ;;  %692 = vmatprep.subr.bf16.mxu0 %v814_v3  ;;  %703 = vmatpush3.bf16.msra.mxu1 %v702_v20 }
  0x16   : > { %p752_p12 = pnand %p751_p11, %p896_p5  ;;  %p757_p0 = scmp.lt.s32.totalorder %s514_s9, %s755_s22 }
  0x17   : > { %s938_s20 = sshll.u32 %s284_s15, 3 }
  0x18   : > { %694 = vmatpush3.bf16.msra.mxu0 %v693_v13  ;;  %s286_s23 = scalar_lea.vmem %s1013_s0, %s938_s20  ;;  %s290_s29 = scalar_lea.vmem %s1019_s6, %s938_s20 }
  0x19   : > { %695 = vmatprep.subr.bf16.mxu0 %v814_v3  ;;  %v295_v17 = vld [vmem:[%s286_s23] sm:$0xff]  ;;  %p753_p13 = pneg %p752_p12  ;;  %s756_s23 = scalar_lea.vmem %s755_s22, 256 }
  0x1a   : > { %p758_p1 = scmp.lt.s32.totalorder %s756_s23, %s750_s19 }
  0x1c   : > { %697 = vmatpush3.bf16.msra.mxu0 %v696_v16  ;;  %p759_p2 = por %p758_p1, %p757_p0 }
  0x1e   : > { %p760_p3 = pnand %p759_p2, %p753_p13 }
  0x1f   : > { %673 = vmatmul.mubr.msk.f32.vlgmr.msra.gmra.mrb[0].mxu0 %vm311_vm1, %v295_v17 }
  0xf2   : > { %v381_v22 = vpop.f32.mrb[0].mxu0 }
  0xf3   : > { %v382_v23 = vadd.f32 %v634_v21, %v381_v22  ;;  %v674_v24 = vpop.f32.mrb[1].mxu0 }
  0xf5   : > { %vm385_vm2 = vcmp.gt.f32.partialorder %v382_v23, 0.0  ;;  %v386_v25 = vmul.f32 0.2, %v382_v23 }
  0xf7   : > { %v387_v26 = vsel %vm385_vm2, %v382_v23, %v386_v25 }
  0xf8   : > { %684 = vmatmul.mubr.msk.f32.vlgmr.msra.gmra.mrb[0].mxu1 %vm388_vm3, %v387_v26  ;;  %389 = vst.msk [vmem:[%s270_s18] sm:$0xff] %vm388_vm3, %v387_v26 }
 0x1cb   : > { %v470_v28 = vpop.f32.mrb[0].mxu1 }
 0x1cc   : > { %v471_v29 = vadd.f32 %v636_v27, %v470_v28  ;;  %v685_v30 = vpop.f32.mrb[1].mxu1 }
 0x1ce   : > { %v476_v31 = vsel %vm474_vm4, %v471_v29, -inf  ;;  %475 = vst.msk [vmem:[%s290_s29] sm:$0xff] %vm474_vm4, %v471_v29 }
 0x1cf   : > { %477 = vmax.xlane.f32.xlu0 %v476_v31 }
 0x25c   : > { %v478_v32 = vpop.xlane.xlu0 %477 }
 0x25d   : > { %v479_v33 = vsub.f32 %v471_v29, %v478_v32 }
 0x25f   : > { %v480_v34 = vmul.f32 1.442695, %v479_v33 }
 0x261   : > { %746 = vpow2.f32 %v480_v34 }
 0x26b   : > { %v747_v35 = vpop.eup %746 }
 0x26c   : > { %v482_v36 = vsel %vm474_vm4, %v747_v35, 0.0 }
 0x26d   : > { %483 = vadd.xlane.f32.xlu0 %v482_v36 }
 0x26e   : > { %763 = shalt.err (!%p760_p3)
}
 0x26f   : > { %s764_s28 = scalar_lea.hbm %s970_s16, 128  ;;  %s768_s29 = scalar_lea.hbm %s1018_s5, 256 }
 0x270   : > { %p765_p4 = scmp.ne.s32.totalorder %s970_s16, %s764_s28  ;;  %p769_p9 = scmp.lt.u32.totalorder %s970_s16, %s1018_s5 }
 0x271   : > { %p770_p10 = scmp.lt.u32.totalorder %s768_s29, %s764_s28  ;;  %p772_p12 = scmp.lt.u32.totalorder %s764_s28, %s970_s16 }
 0x272   : > { %p766_p7 = pnand %p765_p4, %p896_p5 }
 0x273   : > { %p771_p11 = por %p770_p10, %p769_p9 }
 0x274   : > { %p767_p8 = pneg %p766_p7 }
 0x275   : > { %p773_p13 = por %p772_p12, %p771_p11 }
 0x277   : > { %p774_p0 = pnand %p773_p13, %p767_p8 }
 0x279   : > { %777 = shalt.err (!%p774_p0)
}
 0x27a   : > { %704 = dma.vmem_to_hbm [thread:$0]  (%p896_p5), %s514_s9, 128, %s970_s16, %s492_s17  }
 0x27b   : > { %s294_s21 = scalar_lea.vmem %s1020_s7, %s938_s20 }
 0x2fa   : > { %v484_v37 = vpop.xlane.xlu0 %483 }
 0x2fb   : > { %748 = vrcp.f32 %v484_v37 }
 0x305   : > { %v749_v38 = vpop.eup %748 }
 0x306   : > { %v486_v39 = vmul.f32 %v749_v38, %v484_v37 }
 0x308   : > { %v487_v40 = vsub.f32 2.0, %v486_v39 }
 0x30a   : > { %v488_v41 = vmul.f32 %v749_v38, %v487_v40 }
 0x30c   : > { %v489_v42 = vmul.f32 %v747_v35, %v488_v41 }
 0x30e   : > { %490 = vst.msk [vmem:[%s294_s21] sm:$0xff] %vm474_vm4, %v489_v42 }
 0x30f PF: > { %p710_p1 = scmp.ge.s32.totalorder %s812_s27, 2  ;;  %s531_s11 = sand.u32 1, %s800_s24  }
 0x310   : > { %s532_s9 = scalar_lea.sflag [#allocation3], %s531_s11 }
 0x311   : > { %p707_p5 = pnand %p710_p1, %p900_p6 }
 0x313   : > { %795 = dma.done.wait (!%p707_p5), %s532_s9, 128  }
 0x314   : > { %797 = vsyncadd (!%p707_p5), %s532_s9, 4294967168  ;;  %p18_p2 = scmp.ge.s32.totalorder %s883_s30, 4   ;;  %s1023_s24 = smov %s804_s25 }
 0x315   : > { %s1024_s25 = smov %s808_s26  ;;  %s1025_s26 = smov %s894_s10 }
 0x316   : > { %s1026_s27 = smov %s883_s30  ;;  %20 = sbr.rel (!%p18_p2) target bundleno = 3 (0x3), region = 99 }
 0x31d   :  { %551 = vsyncpa [#allocation3], 1 }
 0x31e   :  { %553 = vsyncpa [#allocation3 + $0x1], 1 }

</bundles_post_ra>
